<compile_context>
chip_gen: v6e
topology: v6e:2x2x1
jax: 0.10.0
libtpu: 0.0.40
codegen_flags: <defaults>
</compile_context>

<pallas_src>
import functools

import jax
import jax.numpy as jnp
from jax.experimental import pallas as pl
from jax.experimental.pallas import tpu as pltpu


def _round_up(x, m):
    return ((x + m - 1) // m) * m


# --------------------------- Kernel 1: GRU recurrence -------------------------
def _gru_kernel(x_ref, h0_ref, wih_ref, whh_ref, bih_ref, bhh_ref,
                hall_ref, hfin_ref, h_sc):
    """One GRU step per grid index.  grid = (T,); weights resident in VMEM.

    x_ref   : (B, E)  bf16  embedded tokens for step t (pre-ReLU)
    h0_ref  : (B, H)  f32   initial hidden state (read at t == 0)
    wih_ref : (E, 3H) bf16  input->gates weights (transposed, gate order r|z|n)
    whh_ref : (H, 3H) bf16  hidden->gates weights (transposed)
    bih_ref : (1, 3H) f32   input bias
    bhh_ref : (1, 3H) f32   hidden bias
    hall_ref: (B, H)  bf16  hidden state of step t (feeds the projection kernel)
    hfin_ref: (B, H)  f32   final hidden state (resident; last write wins)
    h_sc    : (B, H)  f32   recurrent hidden state carried across the grid
    """
    t = pl.program_id(0)
    H = h_sc.shape[-1]

    @pl.when(t == 0)
    def _():
        h_sc[...] = h0_ref[...]

    x = jnp.maximum(x_ref[...], 0)                       # relu(embedding), bf16
    h = h_sc[...]                                        # f32 recurrent state
    gi = jnp.dot(x, wih_ref[...],
                 preferred_element_type=jnp.float32) + bih_ref[...]
    gh = jnp.dot(h.astype(jnp.bfloat16), whh_ref[...],
                 preferred_element_type=jnp.float32) + bhh_ref[...]
    r = jax.nn.sigmoid(gi[:, :H] + gh[:, :H])            # PyTorch gate order r|z|n
    z = jax.nn.sigmoid(gi[:, H:2 * H] + gh[:, H:2 * H])
    n = jnp.tanh(gi[:, 2 * H:] + r * gh[:, 2 * H:])      # n = tanh(i_n + r*(h@W+b))
    h_new = (1.0 - z) * n + z * h

    h_sc[...] = h_new
    hall_ref[...] = h_new.astype(jnp.bfloat16)
    hfin_ref[...] = h_new


# ------------------ Kernel 2: output projection + log-sum-exp -----------------
def _proj_kernel(h_ref, w_ref, b_ref, logits_ref, lse_ref, m_sc, l_sc,
                 *, v_total, mask_tail):
    """(tile_m, H) @ (H, tile_v) + online log-sum-exp.  grid = (n_m, n_v).

    h_ref     : (tile_m, H)      bf16  block of T*B hidden rows (resident per m)
    w_ref     : (H, tile_v)      bf16  vocab tile of the projection (transposed)
    b_ref     : (1, tile_v)      f32   vocab tile of the output bias
    logits_ref: (tile_m, tile_v) f32   unnormalized logits tile (streamed out)
    lse_ref   : (tile_m, 1)      f32   log-sum-exp per row (written on last tile)
    m_sc,l_sc : (tile_m, 1)      f32   online max / sum-exp statistics
    """
    v = pl.program_id(1)
    n_v = pl.num_programs(1)
    tile_v = w_ref.shape[-1]

    @pl.when(v == 0)
    def _():
        m_sc[...] = jnp.full_like(m_sc, -jnp.inf)
        l_sc[...] = jnp.zeros_like(l_sc)

    logits = jnp.dot(h_ref[...], w_ref[...],
                     preferred_element_type=jnp.float32) + b_ref[...]
    if mask_tail:
        # V was padded up to a multiple of tile_v: mask the padded tail columns.
        col = v * tile_v + jax.lax.broadcasted_iota(jnp.int32, logits.shape, 1)
        logits = jnp.where(col < v_total, logits, -jnp.inf)
    logits_ref[...] = logits

    m_prev = m_sc[...]
    m_new = jnp.maximum(m_prev, jnp.max(logits, axis=-1, keepdims=True))
    l_sc[...] = (l_sc[...] * jnp.exp(m_prev - m_new)
                 + jnp.sum(jnp.exp(logits - m_new), axis=-1, keepdims=True))
    m_sc[...] = m_new

    @pl.when(v == n_v - 1)
    def _():
        lse_ref[...] = m_sc[...] + jnp.log(l_sc[...])


# ------------------------------ VMEM sizing -----------------------------------
def _gru_vmem_bytes(B, E, H):
    bf16, f32 = 2, 4
    est = (E * 3 * H * bf16 + H * 3 * H * bf16            # GRU weights (resident)
           + 2 * 8 * 3 * H * f32                          # biases (sublane padded)
           + 2 * B * E * bf16 + 2 * B * H * bf16          # x / h_all blocks (dbl-buf)
           + 2 * B * H * f32 + B * H * f32)               # h0, h_final, h scratch
    return int(min(2 * est + (8 << 20), 100 << 20))


def _proj_vmem_bytes(tile_m, tile_v, H):
    bf16, f32 = 2, 4
    est = (2 * tile_m * H * bf16                          # hidden block (dbl-buf)
           + 2 * H * tile_v * bf16 + 2 * 8 * tile_v * f32 # w_out / b_out tiles
           + 2 * tile_m * tile_v * f32                    # logits block (dbl-buf)
           + 2 * tile_m * 128 * f32                       # lse block (lane padded)
           + 2 * tile_m * 128 * f32)                      # m / l scratch
    return int(min(2 * est + (8 << 20), 100 << 20))


# -------------------------------- Wrapper --------------------------------------
def _decoder_steps(token_ids, h0, params, *, tile_v=None, tile_m=None,
                   tile_v_target=4096, tile_m_target=512):
    """Run T fused decode steps.  token_ids: (T, B) int32, h0: (B, H) f32."""
    emb = params["embedding"]                        # (V, E)  bf16
    w_ih, w_hh = params["w_ih"], params["w_hh"]      # (E, 3H), (H, 3H) bf16
    b_ih, b_hh = params["b_ih"], params["b_hh"]      # (1, 3H) f32
    w_out, b_out = params["w_out"], params["b_out"]  # (H, V) bf16, (1, V) f32

    T, B = token_ids.shape
    E = emb.shape[1]
    H = h0.shape[-1]
    V = w_out.shape[-1]

    # ---- vocab tiling: pad V to a multiple of tile_v, mask the tail in-kernel.
    if tile_v is None:
        tile_v = min(_round_up(V, 128), _round_up(tile_v_target, 128))
    else:
        tile_v = _round_up(tile_v, 128)
    V_pad = _round_up(V, tile_v)
    n_v = V_pad // tile_v

    # ---- M tiling over the T*B hidden rows fed to the projection.
    M = T * B
    M_pad = _round_up(M, 8)
    if tile_m is None:
        tile_m = min(M_pad, tile_m_target)
    else:
        tile_m = min(_round_up(tile_m, 8), M_pad)
    M_pad = _round_up(M_pad, tile_m)
    n_m = M_pad // tile_m

    # Embedding gather (glue): (T, B) -> (T, B, E) bf16.
    # TODO(synk): could move in-kernel via scalar-prefetched token ids (useful
    # for a greedy-decode feedback loop); the module contract only needs logps.
    x_all = jnp.take(emb, token_ids, axis=0)

    # ---- phase 1: T GRU steps, weights resident, hidden carried in VMEM ------
    h_all, h_final = pl.pallas_call(
        _gru_kernel,
        out_shape=(
            jax.ShapeDtypeStruct((T, B, H), jnp.bfloat16),
            jax.ShapeDtypeStruct((B, H), jnp.float32),
        ),
        grid=(T,),
        in_specs=[
            pl.BlockSpec((None, B, E), lambda t: (t, 0, 0)),  # x_t
            pl.BlockSpec((B, H), lambda t: (0, 0)),           # h0
            pl.BlockSpec((E, 3 * H), lambda t: (0, 0)),       # w_ih (resident)
            pl.BlockSpec((H, 3 * H), lambda t: (0, 0)),       # w_hh (resident)
            pl.BlockSpec((1, 3 * H), lambda t: (0, 0)),       # b_ih
            pl.BlockSpec((1, 3 * H), lambda t: (0, 0)),       # b_hh
        ],
        out_specs=(
            pl.BlockSpec((None, B, H), lambda t: (t, 0, 0)),  # h_t (bf16)
            pl.BlockSpec((B, H), lambda t: (0, 0)),           # final hidden (f32)
        ),
        scratch_shapes=[pltpu.VMEM((B, H), jnp.float32)],
        compiler_params=pltpu.CompilerParams(
            dimension_semantics=("arbitrary",),               # recurrent axis
            vmem_limit_bytes=_gru_vmem_bytes(B, E, H),
        ),
    )(x_all, h0, w_ih, w_hh, b_ih, b_hh)

    # ---- phase 2: (T*B, H) @ (H, V) projection + online log-sum-exp ----------
    h2d = h_all.reshape(M, H)
    if M_pad != M:
        h2d = jnp.pad(h2d, ((0, M_pad - M), (0, 0)))
    if V_pad != V:
        w_out = jnp.pad(w_out, ((0, 0), (0, V_pad - V)))
        b_out = jnp.pad(b_out, ((0, 0), (0, V_pad - V)))

    proj = functools.partial(_proj_kernel, v_total=V, mask_tail=(V_pad != V))
    logits, lse = pl.pallas_call(
        proj,
        out_shape=(
            jax.ShapeDtypeStruct((M_pad, V_pad), jnp.float32),
            jax.ShapeDtypeStruct((M_pad, 1), jnp.float32),
        ),
        grid=(n_m, n_v),
        in_specs=[
            pl.BlockSpec((tile_m, H), lambda m, v: (m, 0)),       # hidden rows
            pl.BlockSpec((H, tile_v), lambda m, v: (0, v)),       # w_out tile
            pl.BlockSpec((1, tile_v), lambda m, v: (0, v)),       # b_out tile
        ],
        out_specs=(
            pl.BlockSpec((tile_m, tile_v), lambda m, v: (m, v)),  # logits tile
            pl.BlockSpec((tile_m, 1), lambda m, v: (m, 0)),       # lse
        ),
        scratch_shapes=[
            pltpu.VMEM((tile_m, 1), jnp.float32),                 # running max
            pltpu.VMEM((tile_m, 1), jnp.float32),                 # running sum-exp
        ],
        compiler_params=pltpu.CompilerParams(
            # M blocks are independent -> "parallel" (engages v7x's 2nd TC);
            # the vocab axis carries the online lse reduction -> "arbitrary".
            dimension_semantics=("parallel", "arbitrary"),
            vmem_limit_bytes=_proj_vmem_bytes(tile_m, tile_v, H),
        ),
    )(h2d, w_out, b_out)

    # Final normalization: fused XLA slice + subtract (per the review, keeps the
    # kernel's VMEM footprint proportional to tile_v rather than V).
    logp = (logits[:M, :V] - lse[:M]).reshape(T, B, V)
    return logp, h_final


def decoder_forward(input_ids, hidden, params, *, tile_v=None, tile_m=None):
    """Single decode step — PyTorch Decoder.forward semantics.

    input_ids: (1, B) int32; hidden: (1, B, H) f32 -> (logp (B, V), hidden' (1, B, H)).
    """
    logp_all, h_final = _decoder_steps(input_ids, hidden[0], params,
                                       tile_v=tile_v, tile_m=tile_m)
    return logp_all[0], h_final[None]


def decoder_forward_fused(token_ids, hidden, params, *, tile_v=None, tile_m=None):
    """T teacher-forced decode steps fused (GRU weights resident, w_out tiles
    multiplied against all T*B hidden rows at once).

    token_ids: (T, B) int32; hidden: (1, B, H) f32 -> (logp (T, B, V), hidden_T (1, B, H)).
    """
    logp_all, h_final = _decoder_steps(token_ids, hidden[0], params,
                                       tile_v=tile_v, tile_m=tile_m)
    return logp_all, h_final[None]


# ------------------------ Deterministic parameter init ------------------------
def init_params(key, voc_size, embed_size, hidden_size):
    ks = jax.random.split(key, 7)
    scale = 1.0 / jnp.sqrt(hidden_size)
    uni = lambda k, shape: jax.random.uniform(k, shape, jnp.float32, -scale, scale)
    return {
        # weights stored transposed (in_features, out_features) and in bf16 so
        # the MXU runs bf16 x bf16 -> f32; biases stay f32.
        "embedding": jax.random.normal(ks[0], (voc_size, embed_size),
                                       jnp.float32).astype(jnp.bfloat16),
        "w_ih": uni(ks[1], (embed_size, 3 * hidden_size)).astype(jnp.bfloat16),
        "w_hh": uni(ks[2], (hidden_size, 3 * hidden_size)).astype(jnp.bfloat16),
        "b_ih": uni(ks[3], (1, 3 * hidden_size)),
        "b_hh": uni(ks[4], (1, 3 * hidden_size)),
        "w_out": uni(ks[5], (hidden_size, voc_size)).astype(jnp.bfloat16),
        "b_out": uni(ks[6], (1, voc_size)),
    }


# --------------------------------- Reference -----------------------------------
def decoder_forward_ref(input_ids, hidden, params):
    """Pure-JAX reference with the same bf16-weight / f32-accumulate numerics."""
    x = jnp.maximum(jnp.take(params["embedding"], input_ids[0], axis=0), 0)
    h = hidden[0]
    H = h.shape[-1]
    gi = jnp.dot(x, params["w_ih"],
                 preferred_element_type=jnp.float32) + params["b_ih"]
    gh = jnp.dot(h.astype(jnp.bfloat16), params["w_hh"],
                 preferred_element_type=jnp.float32) + params["b_hh"]
    r = jax.nn.sigmoid(gi[:, :H] + gh[:, :H])
    z = jax.nn.sigmoid(gi[:, H:2 * H] + gh[:, H:2 * H])
    n = jnp.tanh(gi[:, 2 * H:] + r * gh[:, 2 * H:])
    h_new = (1.0 - z) * n + z * h
    logits = jnp.dot(h_new.astype(jnp.bfloat16), params["w_out"],
                     preferred_element_type=jnp.float32) + params["b_out"]
    return jax.nn.log_softmax(logits, axis=1), h_new[None]


def decoder_forward_seq_ref(token_ids, hidden, params):
    logps, h = [], hidden
    for t in range(token_ids.shape[0]):
        logp, h = decoder_forward_ref(token_ids[t:t + 1], h, params)
        logps.append(logp)
    return jnp.stack(logps, axis=0), h


# ----------------------------------- Main ---------------------------------------
if __name__ == "__main__":
    embed_size = 32
    hidden_size = 256
    voc_size = 1024     # synthetic vocabulary (Voc is external in the original)
    batch = 8
    seq_len = 4         # fused multi-step decode length

    key = jax.random.PRNGKey(0)
    (k_param, k_in, k_h, k_seq, k_param2, k_in2, k_h2) = jax.random.split(key, 7)

    params = init_params(k_param, voc_size, embed_size, hidden_size)
    input_ids = jax.random.randint(k_in, (1, batch), 0, voc_size, jnp.int32)
    hidden0 = jax.random.normal(k_h, (1, batch, hidden_size), jnp.float32)

    # --- single decode step (original Decoder.forward semantics) --------------
    # tile_v=512 forces 2 vocab tiles so the online log-sum-exp path is exercised.
    logp, hidden1 = decoder_forward(input_ids, hidden0, params, tile_v=512)
    jax.block_until_ready((logp, hidden1))

    logp_ref, hidden1_ref = decoder_forward_ref(input_ids, hidden0, params)
    assert logp.shape == (batch, voc_size)
    assert hidden1.shape == (1, batch, hidden_size)
    assert jnp.allclose(logp, logp_ref, atol=1e-3, rtol=1e-3)
    assert jnp.allclose(hidden1, hidden1_ref, atol=1e-3, rtol=1e-3)

    # --- fused multi-step decode (weights resident; projection over T*B rows) --
    # tile_v=256 / tile_m=16 force a (2, 4) projection grid.
    token_seq = jax.random.randint(k_seq, (seq_len, batch), 0, voc_size, jnp.int32)
    logp_seq, hidden_T = decoder_forward_fused(token_seq, hidden0, params,
                                               tile_v=256, tile_m=16)
    jax.block_until_ready((logp_seq, hidden_T))

    logp_seq_ref, hidden_T_ref = decoder_forward_seq_ref(token_seq, hidden0, params)
    assert logp_seq.shape == (seq_len, batch, voc_size)
    assert jnp.allclose(logp_seq, logp_seq_ref, atol=1e-3, rtol=1e-3)
    assert jnp.allclose(hidden_T, hidden_T_ref, atol=1e-3, rtol=1e-3)

    # --- ragged vocab (no multiple-of-128 divisor): pad + in-kernel mask path --
    voc2, hid2, emb2, b2, T2 = 1000, 128, 32, 8, 2
    params2 = init_params(k_param2, voc2, emb2, hid2)
    ids2 = jax.random.randint(k_in2, (T2, b2), 0, voc2, jnp.int32)
    h02 = jax.random.normal(k_h2, (1, b2, hid2), jnp.float32)
    logp2, hT2 = decoder_forward_fused(ids2, h02, params2, tile_v=384)
    jax.block_until_ready((logp2, hT2))

    logp2_ref, hT2_ref = decoder_forward_seq_ref(ids2, h02, params2)
    assert logp2.shape == (T2, b2, voc2)
    assert jnp.allclose(logp2, logp2_ref, atol=1e-3, rtol=1e-3)
    assert jnp.allclose(hT2, hT2_ref, atol=1e-3, rtol=1e-3)

    print("KERNEL_OK")
</pallas_src>

<mosaic_0001>
module attributes {stable_mosaic.version = 11 : i64} {
  func.func @_gru_kernel(%arg0: i32, %arg1: memref<1x8x32xbf16, #tpu.memory_space<vmem>>, %arg2: memref<8x256xf32, #tpu.memory_space<vmem>>, %arg3: memref<32x768xbf16, #tpu.memory_space<vmem>>, %arg4: memref<256x768xbf16, #tpu.memory_space<vmem>>, %arg5: memref<1x768xf32, #tpu.memory_space<vmem>>, %arg6: memref<1x768xf32, #tpu.memory_space<vmem>>, %arg7: memref<1x8x256xbf16, #tpu.memory_space<vmem>>, %arg8: memref<8x256xf32, #tpu.memory_space<vmem>>, %arg9: memref<8x256xf32, #tpu.memory_space<vmem>>) attributes {dimension_semantics = [#tpu.dimension_semantics<arbitrary>], iteration_bounds = array<i64: 1>, scalar_prefetch = 0 : i64, scratch_operands = 1 : i64, tpu.core_type = #tpu.core_type<tc>, window_params = [{transform_indices = @transform_0, window_bounds = array<i64: 1, 8, 32>}, {pipeline_mode = #tpu.pipeline_mode<synchronous>, transform_indices = @transform_1, window_bounds = array<i64: 8, 256>}, {pipeline_mode = #tpu.pipeline_mode<synchronous>, transform_indices = @transform_2, window_bounds = array<i64: 32, 768>}, {pipeline_mode = #tpu.pipeline_mode<synchronous>, transform_indices = @transform_3, window_bounds = array<i64: 256, 768>}, {pipeline_mode = #tpu.pipeline_mode<synchronous>, transform_indices = @transform_4, window_bounds = array<i64: 1, 768>}, {pipeline_mode = #tpu.pipeline_mode<synchronous>, transform_indices = @transform_5, window_bounds = array<i64: 1, 768>}, {transform_indices = @transform_6, window_bounds = array<i64: 1, 8, 256>}, {pipeline_mode = #tpu.pipeline_mode<synchronous>, transform_indices = @transform_7, window_bounds = array<i64: 8, 256>}]} {
    %c0_i32 = arith.constant 0 : i32
    %0 = arith.cmpi eq, %arg0, %c0_i32 : i32
    %1 = arith.extui %0 : i1 to i32
    %c0_i32_0 = arith.constant 0 : i32
    %2 = arith.cmpi ne, %1, %c0_i32_0 : i32
    scf.if %2 {
      %c0_25 = arith.constant 0 : index
      %c0_26 = arith.constant 0 : index
      %51 = vector.load %arg2[%c0_25, %c0_26] : memref<8x256xf32, #tpu.memory_space<vmem>>, vector<8x256xf32>
      %c0_27 = arith.constant 0 : index
      %c0_28 = arith.constant 0 : index
      %52 = vector.load %arg9[%c0_27, %c0_28] : memref<8x256xf32, #tpu.memory_space<vmem>>, vector<8x256xf32>
      tpu.vector_store %arg9[%c0_27, %c0_28], %51 {strides = array<i32>} : memref<8x256xf32, #tpu.memory_space<vmem>>, vector<8x256xf32>,
    } else {
    }
    %c0 = arith.constant 0 : index
    %c0_1 = arith.constant 0 : index
    %c0_2 = arith.constant 0 : index
    %3 = vector.load %arg1[%c0, %c0_1, %c0_2] : memref<1x8x32xbf16, #tpu.memory_space<vmem>>, vector<1x8x32xbf16>
    %4 = vector.shape_cast %3 : vector<1x8x32xbf16> to vector<8x32xbf16>
    %cst = arith.constant 0.000000e+00 : bf16
    %5 = vector.broadcast %cst : bf16 to vector<8x32xbf16>
    %6 = arith.maximumf %4, %5 : vector<8x32xbf16>
    %c0_3 = arith.constant 0 : index
    %c0_4 = arith.constant 0 : index
    %7 = vector.load %arg9[%c0_3, %c0_4] : memref<8x256xf32, #tpu.memory_space<vmem>>, vector<8x256xf32>
    %c0_5 = arith.constant 0 : index
    %c0_6 = arith.constant 0 : index
    %8 = vector.load %arg3[%c0_5, %c0_6] : memref<32x768xbf16, #tpu.memory_space<vmem>>, vector<32x768xbf16>
    %cst_7 = arith.constant dense<0.000000e+00> : vector<8x768xf32>
    %9 = tpu.matmul %6, %8, %cst_7 {dimension_numbers = #tpu.dot_dimension_numbers<[1], [0], [0], [1], [0, 0, 1, 1], [], []>} : vector<8x32xbf16>, vector<32x768xbf16>, vector<8x768xf32> -> vector<8x768xf32>
    %c0_8 = arith.constant 0 : index
    %c0_9 = arith.constant 0 : index
    %10 = vector.load %arg5[%c0_8, %c0_9] : memref<1x768xf32, #tpu.memory_space<vmem>>, vector<1x768xf32>
    %11 = vector.broadcast %10 : vector<1x768xf32> to vector<8x768xf32>
    %12 = arith.addf %9, %11 : vector<8x768xf32>
    %13 = arith.truncf %7 : vector<8x256xf32> to vector<8x256xbf16>
    %c0_10 = arith.constant 0 : index
    %c0_11 = arith.constant 0 : index
    %14 = vector.load %arg4[%c0_10, %c0_11] : memref<256x768xbf16, #tpu.memory_space<vmem>>, vector<256x768xbf16>
    %cst_12 = arith.constant dense<0.000000e+00> : vector<8x768xf32>
    %15 = tpu.matmul %13, %14, %cst_12 {dimension_numbers = #tpu.dot_dimension_numbers<[1], [0], [0], [1], [0, 0, 1, 1], [], []>} : vector<8x256xbf16>, vector<256x768xbf16>, vector<8x768xf32> -> vector<8x768xf32>
    %c0_13 = arith.constant 0 : index
    %c0_14 = arith.constant 0 : index
    %16 = vector.load %arg6[%c0_13, %c0_14] : memref<1x768xf32, #tpu.memory_space<vmem>>, vector<1x768xf32>
    %17 = vector.broadcast %16 : vector<1x768xf32> to vector<8x768xf32>
    %18 = arith.addf %15, %17 : vector<8x768xf32>
    %19 = vector.extract_strided_slice %12 {offsets = [0, 0], sizes = [8, 256], strides = [1, 1]} : vector<8x768xf32> to vector<8x256xf32>
    %20 = vector.extract_strided_slice %18 {offsets = [0, 0], sizes = [8, 256], strides = [1, 1]} : vector<8x768xf32> to vector<8x256xf32>
    %21 = arith.addf %19, %20 : vector<8x256xf32>
    %22 = arith.negf %21 : vector<8x256xf32>
    %23 = math.exp %22 : vector<8x256xf32>
    %cst_15 = arith.constant 1.000000e+00 : f32
    %24 = vector.broadcast %cst_15 : f32 to vector<8x256xf32>
    %25 = arith.addf %24, %23 : vector<8x256xf32>
    %26 = arith.divf %24, %25 : vector<8x256xf32>
    %27 = vector.extract_strided_slice %12 {offsets = [0, 256], sizes = [8, 256], strides = [1, 1]} : vector<8x768xf32> to vector<8x256xf32>
    %28 = vector.extract_strided_slice %18 {offsets = [0, 256], sizes = [8, 256], strides = [1, 1]} : vector<8x768xf32> to vector<8x256xf32>
    %29 = arith.addf %27, %28 : vector<8x256xf32>
    %30 = arith.negf %29 : vector<8x256xf32>
    %31 = math.exp %30 : vector<8x256xf32>
    %cst_16 = arith.constant 1.000000e+00 : f32
    %32 = vector.broadcast %cst_16 : f32 to vector<8x256xf32>
    %33 = arith.addf %32, %31 : vector<8x256xf32>
    %34 = arith.divf %32, %33 : vector<8x256xf32>
    %35 = vector.extract_strided_slice %12 {offsets = [0, 512], sizes = [8, 256], strides = [1, 1]} : vector<8x768xf32> to vector<8x256xf32>
    %36 = vector.extract_strided_slice %18 {offsets = [0, 512], sizes = [8, 256], strides = [1, 1]} : vector<8x768xf32> to vector<8x256xf32>
    %37 = arith.mulf %26, %36 : vector<8x256xf32>
    %38 = arith.addf %35, %37 : vector<8x256xf32>
    %39 = math.tanh %38 : vector<8x256xf32>
    %cst_17 = arith.constant 1.000000e+00 : f32
    %40 = vector.broadcast %cst_17 : f32 to vector<8x256xf32>
    %41 = arith.subf %40, %34 : vector<8x256xf32>
    %42 = arith.mulf %41, %39 : vector<8x256xf32>
    %43 = arith.mulf %34, %7 : vector<8x256xf32>
    %44 = arith.addf %42, %43 : vector<8x256xf32>
    %c0_18 = arith.constant 0 : index
    %c0_19 = arith.constant 0 : index
    %45 = vector.load %arg9[%c0_18, %c0_19] : memref<8x256xf32, #tpu.memory_space<vmem>>, vector<8x256xf32>
    tpu.vector_store %arg9[%c0_18, %c0_19], %44 {strides = array<i32>} : memref<8x256xf32, #tpu.memory_space<vmem>>, vector<8x256xf32>,
    %46 = arith.truncf %44 : vector<8x256xf32> to vector<8x256xbf16>
    %c0_20 = arith.constant 0 : index
    %c0_21 = arith.constant 0 : index
    %c0_22 = arith.constant 0 : index
    %47 = vector.load %arg7[%c0_20, %c0_21, %c0_22] : memref<1x8x256xbf16, #tpu.memory_space<vmem>>, vector<1x8x256xbf16>
    %48 = vector.shape_cast %47 : vector<1x8x256xbf16> to vector<8x256xbf16>
    %49 = vector.shape_cast %46 : vector<8x256xbf16> to vector<1x8x256xbf16>
    tpu.vector_store %arg7[%c0_20, %c0_21, %c0_22], %49 {strides = array<i32>} : memref<1x8x256xbf16, #tpu.memory_space<vmem>>, vector<1x8x256xbf16>,
    %c0_23 = arith.constant 0 : index
    %c0_24 = arith.constant 0 : index
    %50 = vector.load %arg8[%c0_23, %c0_24] : memref<8x256xf32, #tpu.memory_space<vmem>>, vector<8x256xf32>
    tpu.vector_store %arg8[%c0_23, %c0_24], %44 {strides = array<i32>} : memref<8x256xf32, #tpu.memory_space<vmem>>, vector<8x256xf32>,
    return
  }
  func.func @transform_0(%arg0: i32) -> (i32, i32, i32) {
    %c0_i32 = arith.constant 0 : i32
    %c0_i32_0 = arith.constant 0 : i32
    %c0_i32_1 = arith.constant 0 : i32
    return %arg0, %c0_i32, %c0_i32_0 : i32, i32, i32
  }
  func.func @transform_1(%arg0: i32) -> (i32, i32) {
    %c0_i32 = arith.constant 0 : i32
    %c0_i32_0 = arith.constant 0 : i32
    %c0_i32_1 = arith.constant 0 : i32
    return %c0_i32, %c0_i32_0 : i32, i32
  }
  func.func @transform_2(%arg0: i32) -> (i32, i32) {
    %c0_i32 = arith.constant 0 : i32
    %c0_i32_0 = arith.constant 0 : i32
    %c0_i32_1 = arith.constant 0 : i32
    return %c0_i32, %c0_i32_0 : i32, i32
  }
  func.func @transform_3(%arg0: i32) -> (i32, i32) {
    %c0_i32 = arith.constant 0 : i32
    %c0_i32_0 = arith.constant 0 : i32
    %c0_i32_1 = arith.constant 0 : i32
    return %c0_i32, %c0_i32_0 : i32, i32
  }
  func.func @transform_4(%arg0: i32) -> (i32, i32) {
    %c0_i32 = arith.constant 0 : i32
    %c0_i32_0 = arith.constant 0 : i32
    %c0_i32_1 = arith.constant 0 : i32
    return %c0_i32, %c0_i32_0 : i32, i32
  }
  func.func @transform_5(%arg0: i32) -> (i32, i32) {
    %c0_i32 = arith.constant 0 : i32
    %c0_i32_0 = arith.constant 0 : i32
    %c0_i32_1 = arith.constant 0 : i32
    return %c0_i32, %c0_i32_0 : i32, i32
  }
  func.func @transform_6(%arg0: i32) -> (i32, i32, i32) {
    %c0_i32 = arith.constant 0 : i32
    %c0_i32_0 = arith.constant 0 : i32
    %c0_i32_1 = arith.constant 0 : i32
    return %arg0, %c0_i32, %c0_i32_0 : i32, i32, i32
  }
  func.func @transform_7(%arg0: i32) -> (i32, i32) {
    %c0_i32 = arith.constant 0 : i32
    %c0_i32_0 = arith.constant 0 : i32
    %c0_i32_1 = arith.constant 0 : i32
    return %c0_i32, %c0_i32_0 : i32, i32
  }
}

</mosaic_0001>

<bundles_post_ra>
// kernel: tpu_custom_call.1
= control target key start
LH: loop header
LB: loop body
LE: loop exit
PB: predicated region body
PF: predicated region fallthrough
CT: control target
= control target key end

     0   :  { %13 = vsyncpa [#allocation4], 0  ;;  %s1709_s0 = inlined_call_operand.hbm [shape: bf16[1,8,32], index: 0, kind: input, shape index: {}]   ;;  %s1710_s1 = inlined_call_operand.hbm [shape: f32[8,256], index: 1, kind: input, shape index: {}]   ;;  %s1711_s2 = inlined_call_operand.hbm [shape: bf16[32,768], index: 2, kind: input, shape index: {}]   ;;  %s1712_s3 = inlined_call_operand.hbm [shape: bf16[256,768], index: 3, kind: input, shape index: {}]   ;;  %s1713_s4 = inlined_call_operand.vmem [shape: f32[1,768], index: 4, kind: input, shape index: {}]   ;;  %s1714_s5 = inlined_call_operand.hbm [shape: f32[1,768], index: 5, kind: input, shape index: {}]   ;;  %s1715_s6 = inlined_call_operand.hbm [shape: bf16[1,8,256], index: 6, kind: output, shape index: {0}]   ;;  %s1716_s7 = inlined_call_operand.hbm [shape: f32[8,256], index: 7, kind: output, shape index: {1}]  }
   0x1   :  { %14 = vsyncpa [#allocation7], 0 }
   0x2   :  { %15 = vsyncpa [#allocation10], 0 }
   0x3   :  { %16 = vsyncpa [#allocation5], 0 }
   0x4   :  { %17 = vsyncpa [#allocation14], 0  ;;  %s1611_s24 = smov [#allocation6]  }
   0x5   :  { %s34_s25 = sshll.u32 %s1611_s24, 4  ;;  %s35_s25 = int_to_ptr.vmem [resolvable:$true] %s34_s25 }
   0x6   :  { %s1469_s26 = scalar_lea.vmem %s35_s25, 256  ;;  %p1474_p1 = scmp.lt.s32.totalorder %s35_s25, %s35_s25 }
   0x7   :  { %p1470_p0 = scmp.ne.s32.totalorder %s35_s25, %s1469_s26  ;;  %p1475_p2 = scmp.lt.s32.totalorder %s1469_s26, %s1469_s26 }
   0x9   :  { %p1476_p3 = por %p1475_p2, %p1474_p1 }
   0xb   :  { %p1477_p4 = pnand %p1476_p3, %p1470_p0 }
   0xd   :  { %1480 = shalt.err (!%p1477_p4)
}
   0xe   :  { %37 = dma.hbm_to_vmem [thread:$0]  %s1710_s1, 256, %s35_s25, [#allocation7]  }
   0xf   :  { %s1612_s29 = smov [#allocation9]   ;;  %s1613_s8 = smov [#allocation3]  }
  0x10   :  { %s55_s30 = sshll.u32 %s1612_s29, 4  ;;  %s24_s9 = sshll.u32 %s1613_s8, 4  ;;  %s56_s30 = int_to_ptr.vmem [resolvable:$true] %s55_s30  ;;  %s25_s9 = int_to_ptr.vmem [resolvable:$true] %s24_s9 }
  0x11   :  { %s1489_s10 = scalar_lea.vmem %s56_s30, 12288  ;;  %p1494_p6 = scmp.lt.s32.totalorder %s56_s30, %s56_s30 }
  0x12   :  { %p1490_p5 = scmp.ne.s32.totalorder %s56_s30, %s1489_s10  ;;  %p1495_p7 = scmp.lt.s32.totalorder %s1489_s10, %s1489_s10 }
  0x14   :  { %p1496_p8 = por %p1495_p7, %p1494_p6 }
  0x16   :  { %p1497_p9 = pnand %p1496_p8, %p1490_p5 }
  0x18   :  { %1500 = shalt.err (!%p1497_p9)
}
  0x19   :  { %s1614_s11 = smov 384   ;;  %s1615_s12 = smov 24  }
  0x1a   :  { %61 = dma.hbm_to_vmem [thread:$0]  %s1712_s3, 12288, %s56_s30, [#allocation10], %s1614_s11, %s1614_s11, %s1615_s12  }
  0x1b   :  { %s1509_s1 = scalar_lea.vmem %s25_s9, 64  ;;  %p1514_p11 = scmp.lt.s32.totalorder %s25_s9, %s25_s9 }
  0x1c   :  { %p1510_p10 = scmp.ne.s32.totalorder %s25_s9, %s1509_s1  ;;  %p1515_p12 = scmp.lt.s32.totalorder %s1509_s1, %s1509_s1 }
  0x1e   :  { %p1516_p13 = por %p1515_p12, %p1514_p11 }
  0x20   :  { %p1517_p0 = pnand %p1516_p13, %p1510_p10 }
  0x22   :  { %1520 = shalt.err (!%p1517_p0)
}
  0x23   :  { %27 = dma.hbm_to_vmem [thread:$0]  %s1709_s0, 64, %s25_s9, [#allocation4]  }
  0x24   :  { %s1616_s17 = smov [#allocation8]   ;;  %s1617_s19 = smov [#allocation11]  }
  0x25   :  { %s43_s18 = sshll.u32 %s1616_s17, 4  ;;  %s70_s20 = sshll.u32 %s1617_s19, 4  ;;  %s44_s18 = int_to_ptr.vmem [resolvable:$true] %s43_s18  ;;  %s71_s20 = int_to_ptr.vmem [resolvable:$true] %s70_s20 }
  0x26   :  { %s1529_s21 = scalar_lea.vmem %s44_s18, 1536  ;;  %p1534_p2 = scmp.lt.s32.totalorder %s44_s18, %s44_s18 }
  0x27   :  { %p1530_p1 = scmp.ne.s32.totalorder %s44_s18, %s1529_s21  ;;  %p1535_p3 = scmp.lt.s32.totalorder %s1529_s21, %s1529_s21 }
  0x29   :  { %p1536_p4 = por %p1535_p3, %p1534_p2 }
  0x2b   :  { %p1537_p5 = pnand %p1536_p4, %p1530_p1 }
  0x2d   :  { %1540 = shalt.err (!%p1537_p5)
}
  0x2e   :  { %49 = dma.hbm_to_vmem [thread:$0]  %s1711_s2, 1536, %s44_s18, [#allocation7], %s1614_s11, %s1614_s11, %s1615_s12  }
  0x2f   :  { %s1549_s23 = scalar_lea.vmem %s71_s20, 96  ;;  %p1554_p7 = scmp.lt.s32.totalorder %s71_s20, %s71_s20 }
  0x30   :  { %p1550_p6 = scmp.ne.s32.totalorder %s71_s20, %s1549_s23  ;;  %p1555_p8 = scmp.lt.s32.totalorder %s1549_s23, %s1549_s23 }
  0x32   :  { %p1556_p9 = por %p1555_p8, %p1554_p7 }
  0x34   :  { %p1557_p10 = pnand %p1556_p9, %p1550_p6 }
  0x36   :  { %1560 = shalt.err (!%p1557_p10)
}
  0x37   :  { %73 = dma.hbm_to_vmem [thread:$0]  %s1714_s5, 96, %s71_s20, [#allocation10]  }
  0x38   :  { %1601 = dma.done.wait [#allocation4], 64  }
  0x39   :  { %1602 = vsyncadd [#allocation4], 4294967232 }
  0x3a   :  { %1603 = dma.done.wait [#allocation7], 1792  }
  0x3b   :  { %1604 = vsyncadd [#allocation7], 4294965504 }
  0x3c   :  { %1605 = dma.done.wait [#allocation10], 12384  }
  0x3d   :  { %1606 = vsyncadd [#allocation10], 4294954912  ;;  %v1618_v0 = vmov 0   ;;  %v1279_v1 = vld [vmem:[#allocation8 + $0x34] ss:$24 sps:$4 sm:$0xff]   ;;  %vm206_vm0 = vcmask 261120  }
  0x3e   :  { %242 = vmatprep.mubr.bf16.mxu0 %v1618_v0  ;;  %v1281_v2 = vld [vmem:[#allocation9 + $0x154] ss:$24 sps:$4 sm:$0xff]   ;;  %222 = vmatprep.subr.bf16.mxu0 %v1279_v1  ;;  %v1283_v3 = vld [vmem:[#allocation8 + $0x30] ss:$24 sps:$4 sm:$0xff]   ;;  %v1285_v5 = vld [vmem:[#allocation8 + $0x4] ss:$24 sps:$4 sm:$0xff]  }
  0x3f   :  { %v1284_v4 = vld [vmem:[#allocation9 + $0x150] ss:$24 sps:$4 sm:$0xff]   ;;  %943 = vmatprep.subr.bf16.mxu1 %v1281_v2  ;;  %223 = vmatpush1.bf16.msra.mxu0 %v1283_v3  ;;  %v1287_v6 = vld [vmem:[#allocation9 + $0x124] ss:$24 sps:$4 sm:$0xff]   ;;  %v1289_v7 = vld [vmem:[#allocation8] ss:$24 sps:$4 sm:$0xff]  }
  0x40   :  { %944 = vmatpush1.bf16.msra.mxu1 %v1284_v4  ;;  %224 = vmatprep.subr.bf16.mxu0 %v1285_v5  ;;  %v1290_v8 = vld [vmem:[#allocation9 + $0x120] ss:$24 sps:$4 sm:$0xff]   ;;  %v1293_v10 = vld [vmem:[#allocation8 + $0x3c] ss:$24 sps:$4 sm:$0xff]   ;;  %v98_v12 = vld [vmem:[#allocation3] sm:$0xf] }
  0x41   :  { %945 = vmatprep.subr.bf16.mxu1 %v1287_v6  ;;  %v1291_v9 = vld [vmem:[#allocation8 + $0x38] ss:$24 sps:$4 sm:$0xff]   ;;  %v1294_v11 = vld [vmem:[#allocation9 + $0xf4] ss:$24 sps:$4 sm:$0xff]   ;;  %v99_v13 = vmax.bf16 %v1618_v0, %v98_v12  ;;  %v1300_v16 = vld [vmem:[#allocation9 + $0xc4] ss:$24 sps:$4 sm:$0xff]  }
  0x42   :  { %v1296_v14 = vld [vmem:[#allocation9 + $0xf0] ss:$24 sps:$4 sm:$0xff]   ;;  %v1299_v15 = vld [vmem:[#allocation8 + $0xc] ss:$24 sps:$4 sm:$0xff]   ;;  %v1302_v18 = vld [vmem:[#allocation9 + $0xc0] ss:$24 sps:$4 sm:$0xff]  }
  0x43   :  { %225 = vmatpush1.bf16.msra.mxu0 %v1289_v7  ;;  %v1297_v17 = vld [vmem:[#allocation8 + $0x8] ss:$24 sps:$4 sm:$0xff]   ;;  %v1305_v19 = vld [vmem:[#allocation8 + $0x44] ss:$24 sps:$4 sm:$0xff]   ;;  %v1306_v20 = vld [vmem:[#allocation9 + $0x94] ss:$24 sps:$4 sm:$0xff]  }
  0x44   :  { %946 = vmatpush1.bf16.msra.mxu1 %v1290_v8  ;;  %263 = vmatprep.subr.bf16.mxu0 %v1293_v10  ;;  %v1303_v21 = vld [vmem:[#allocation8 + $0x40] ss:$24 sps:$4 sm:$0xff]   ;;  %v1308_v22 = vld [vmem:[#allocation9 + $0x90] ss:$24 sps:$4 sm:$0xff]   ;;  %v1311_v23 = vld [vmem:[#allocation8 + $0x14] ss:$24 sps:$4 sm:$0xff]  }
  0x45   :  { %947 = vmatprep.subr.bf16.mxu1 %v1294_v11  ;;  %v1312_v24 = vld [vmem:[#allocation9 + $0x64] ss:$24 sps:$4 sm:$0xff]   ;;  %v1309_v25 = vld [vmem:[#allocation8 + $0x10] ss:$24 sps:$4 sm:$0xff]   ;;  %v1314_v26 = vld [vmem:[#allocation9 + $0x60] ss:$24 sps:$4 sm:$0xff]  }
  0x46   :  { %1164 = vmatmul.mubr.msk.bf16.vlgmr.msra.gmra.mxu0 %vm206_vm0, %v99_v13  ;;  %v1315_v27 = vld [vmem:[#allocation9 + $0x34] ss:$24 sps:$4 sm:$0xff]   ;;  %v1317_v29 = vld [vmem:[#allocation9 + $0x158] ss:$24 sps:$4 sm:$0xff]   ;;  %v1321_v31 = vld [vmem:[#allocation9 + $0x4] ss:$24 sps:$4 sm:$0xff]  }
  0x47   :  { %264 = vmatpush1.bf16.msra.mxu0 %v1291_v9  ;;  %283 = vmatprep.mubr.bf16.mxu0 %v1618_v0  ;;  %v1319_v28 = vld [vmem:[#allocation9 + $0x15c] ss:$24 sps:$4 sm:$0xff]   ;;  %v1320_v30 = vld [vmem:[#allocation9 + $0x30] ss:$24 sps:$4 sm:$0xff]   ;;  %v1325_v32 = vld [vmem:[#allocation9 + $0x12c] ss:$24 sps:$4 sm:$0xff]  }
  0x48   :  { %948 = vmatpush1.bf16.msra.mxu1 %v1296_v14  ;;  %265 = vmatprep.subr.bf16.mxu0 %v1299_v15  ;;  %v1323_v33 = vld [vmem:[#allocation9 + $0x128] ss:$24 sps:$4 sm:$0xff]   ;;  %v1327_v35 = vld [vmem:[#allocation9 + $0x2d4] ss:$24 sps:$4 sm:$0xff]   ;;  %v1329_v37 = vld [vmem:[#allocation9 + $0xf8] ss:$24 sps:$4 sm:$0xff]  }
  0x49   :  { %949 = vmatprep.subr.bf16.mxu1 %v1300_v16  ;;  %v1326_v34 = vld [vmem:[#allocation9] ss:$24 sps:$4 sm:$0xff]   ;;  %v1331_v36 = vld [vmem:[#allocation9 + $0xfc] ss:$24 sps:$4 sm:$0xff]   ;;  %v1332_v38 = vld [vmem:[#allocation9 + $0x2d0] ss:$24 sps:$4 sm:$0xff]  }
  0x4a   :  { %v1333_v39 = vld [vmem:[#allocation9 + $0x2a4] ss:$24 sps:$4 sm:$0xff]   ;;  %v1335_v41 = vld [vmem:[#allocation9 + $0xc8] ss:$24 sps:$4 sm:$0xff]   ;;  %v1339_v43 = vld [vmem:[#allocation9 + $0x274] ss:$24 sps:$4 sm:$0xff]  }
  0x4b   :  { %266 = vmatpush1.bf16.msra.mxu0 %v1297_v17  ;;  %v1337_v40 = vld [vmem:[#allocation9 + $0xcc] ss:$24 sps:$4 sm:$0xff]   ;;  %v1338_v42 = vld [vmem:[#allocation9 + $0x2a0] ss:$24 sps:$4 sm:$0xff]   ;;  %v1343_v44 = vld [vmem:[#allocation9 + $0x9c] ss:$24 sps:$4 sm:$0xff]  }
  0x4c   :  { %950 = vmatpush1.bf16.msra.mxu1 %v1302_v18  ;;  %304 = vmatprep.subr.bf16.mxu0 %v1305_v19  ;;  %v1341_v45 = vld [vmem:[#allocation9 + $0x98] ss:$24 sps:$4 sm:$0xff]   ;;  %v1345_v47 = vld [vmem:[#allocation9 + $0x244] ss:$24 sps:$4 sm:$0xff]   ;;  %v1347_v49 = vld [vmem:[#allocation9 + $0x68] ss:$24 sps:$4 sm:$0xff]  }
  0x4d   :  { %951 = vmatprep.subr.bf16.mxu1 %v1306_v20  ;;  %v1344_v46 = vld [vmem:[#allocation9 + $0x270] ss:$24 sps:$4 sm:$0xff]   ;;  %v1349_v48 = vld [vmem:[#allocation9 + $0x6c] ss:$24 sps:$4 sm:$0xff]   ;;  %v1679_v50 = vld [vmem:[#allocation6 + $0x8] sm:$0xff]  ;;  %s1620_s26 = smov [#allocation12]  }
  0x4e   :  { %1165 = vmatmul.mubr.msk.bf16.vlgmr.msra.gmra.mxu0 %vm206_vm0, %v99_v13  ;;  %v1350_v51 = vld [vmem:[#allocation9 + $0x240] ss:$24 sps:$4 sm:$0xff]   ;;  %v1351_v52 = vld [vmem:[#allocation9 + $0x214] ss:$24 sps:$4 sm:$0xff]   ;;  %v334_v53 = vpack.c.bf16 %v1679_v50, %v1679_v50  ;;  %v1356_v56 = vld [vmem:[#allocation9 + $0x210] ss:$24 sps:$4 sm:$0xff]  }
  0x4f   :  { %305 = vmatpush1.bf16.msra.mxu0 %v1303_v21  ;;  %324 = vmatprep.mubr.bf16.mxu0 %v1618_v0  ;;  %v1355_v54 = vld [vmem:[#allocation9 + $0x3c] ss:$24 sps:$4 sm:$0xff]   ;;  %v1353_v55 = vld [vmem:[#allocation9 + $0x38] ss:$24 sps:$4 sm:$0xff]   ;;  %v1361_v58 = vld [vmem:[#allocation9 + $0xc] ss:$24 sps:$4 sm:$0xff]  }
  0x50   :  { %952 = vmatpush1.bf16.msra.mxu1 %v1308_v22  ;;  %306 = vmatprep.subr.bf16.mxu0 %v1311_v23  ;;  %v1357_v57 = vld [vmem:[#allocation9 + $0x1e4] ss:$24 sps:$4 sm:$0xff]   ;;  %v1359_v59 = vld [vmem:[#allocation9 + $0x8] ss:$24 sps:$4 sm:$0xff]   ;;  %v1363_v61 = vld [vmem:[#allocation9 + $0x1b4] ss:$24 sps:$4 sm:$0xff]  }
  0x51   :  { %953 = vmatprep.subr.bf16.mxu1 %v1312_v24  ;;  %975 = vmatprep.mubr.bf16.mxu1 %v334_v53  ;;  %v1362_v60 = vld [vmem:[#allocation9 + $0x1e0] ss:$24 sps:$4 sm:$0xff]   ;;  %v1367_v62 = vld [vmem:[#allocation9 + $0x2dc] ss:$24 sps:$4 sm:$0xff]   ;;  %v1368_v0 = vld [vmem:[#allocation9 + $0x1b0] ss:$24 sps:$4 sm:$0xff]  }
  0x52   :  { %v1365_v63 = vld [vmem:[#allocation9 + $0x2d8] ss:$24 sps:$4 sm:$0xff]   ;;  %v1369_v1 = vld [vmem:[#allocation9 + $0x184] ss:$24 sps:$4 sm:$0xff]   ;;  %v1371_v3 = vld [vmem:[#allocation9 + $0x2a8] ss:$24 sps:$4 sm:$0xff]  }
  0x53   :  { %307 = vmatpush1.bf16.msra.mxu0 %v1309_v25  ;;  %v1373_v2 = vld [vmem:[#allocation9 + $0x2ac] ss:$24 sps:$4 sm:$0xff]   ;;  %v1374_v4 = vld [vmem:[#allocation9 + $0x180] ss:$24 sps:$4 sm:$0xff]   ;;  %v1683_v5 = vld [vmem:[#allocation6] sm:$0xff]  ;;  %s1127_s27 = sshll.u32 %s1620_s26, 4  ;;  %s1128_s27 = int_to_ptr.vmem [resolvable:$true] %s1127_s27 }
  0x54   :  { %954 = vmatpush1.bf16.msra.mxu1 %v1314_v26  ;;  %984 = vmatprep.subr.bf16.mxu0 %v1319_v28  ;;  %v1377_v6 = vld [vmem:[#allocation9 + $0x27c] ss:$24 sps:$4 sm:$0xff]   ;;  %v1687_v8 = vpack.c.bf16 %v1683_v5, %v1683_v5  ;;  %v1375_v9 = vld [vmem:[#allocation9 + $0x278] ss:$24 sps:$4 sm:$0xff]   ;;  %v1383_v11 = vld [vmem:[#allocation9 + $0x24c] ss:$24 sps:$4 sm:$0xff]  }
  0x55   :  { %955 = vmatprep.subr.bf16.mxu1 %v1315_v27  ;;  %v1380_v7 = vld [vmem:[#allocation9 + $0x164] ss:$24 sps:$4 sm:$0xff]   ;;  %v1378_v10 = vld [vmem:[#allocation9 + $0x160] ss:$24 sps:$4 sm:$0xff]   ;;  %v1386_v12 = vld [vmem:[#allocation9 + $0x134] ss:$24 sps:$4 sm:$0xff]  }
  0x56   :  { %1166 = vmatmul.mubr.msk.bf16.vlgmr.msra.gmra.mxu0 %vm206_vm0, %v99_v13  ;;  %v1381_v13 = vld [vmem:[#allocation9 + $0x248] ss:$24 sps:$4 sm:$0xff]   ;;  %v1389_v15 = vld [vmem:[#allocation9 + $0x21c] ss:$24 sps:$4 sm:$0xff]   ;;  %v1387_v17 = vld [vmem:[#allocation9 + $0x218] ss:$24 sps:$4 sm:$0xff]  }
  0x57   :  { %985 = vmatpush1.bf16.msra.mxu0 %v1317_v29  ;;  %1016 = vmatprep.mubr.bf16.mxu0 %v334_v53  ;;  %v1384_v14 = vld [vmem:[#allocation9 + $0x130] ss:$24 sps:$4 sm:$0xff]   ;;  %v1392_v16 = vld [vmem:[#allocation9 + $0x104] ss:$24 sps:$4 sm:$0xff]   ;;  %v1390_v18 = vld [vmem:[#allocation9 + $0x100] ss:$24 sps:$4 sm:$0xff]  }
  0x58   :  { %956 = vmatpush1.bf16.msra.mxu1 %v1320_v30  ;;  %986 = vmatprep.subr.bf16.mxu0 %v1325_v32  ;;  %v1395_v19 = vld [vmem:[#allocation9 + $0x1ec] ss:$24 sps:$4 sm:$0xff]   ;;  %v1393_v21 = vld [vmem:[#allocation9 + $0x1e8] ss:$24 sps:$4 sm:$0xff]   ;;  %v1401_v23 = vld [vmem:[#allocation9 + $0x1bc] ss:$24 sps:$4 sm:$0xff]  }
  0x59   :  { %957 = vmatprep.subr.bf16.mxu1 %v1321_v31  ;;  %v1398_v20 = vld [vmem:[#allocation9 + $0xd4] ss:$24 sps:$4 sm:$0xff]   ;;  %v1396_v22 = vld [vmem:[#allocation9 + $0xd0] ss:$24 sps:$4 sm:$0xff]   ;;  %v1404_v24 = vld [vmem:[#allocation9 + $0xa4] ss:$24 sps:$4 sm:$0xff]  }
  0x5a   :  { %v1399_v25 = vld [vmem:[#allocation9 + $0x1b8] ss:$24 sps:$4 sm:$0xff]   ;;  %v1407_v27 = vld [vmem:[#allocation9 + $0x18c] ss:$24 sps:$4 sm:$0xff]   ;;  %v1405_v29 = vld [vmem:[#allocation9 + $0x188] ss:$24 sps:$4 sm:$0xff]  }
  0x5b   :  { %987 = vmatpush1.bf16.msra.mxu0 %v1323_v33  ;;  %v1402_v26 = vld [vmem:[#allocation9 + $0xa0] ss:$24 sps:$4 sm:$0xff]   ;;  %v1410_v28 = vld [vmem:[#allocation9 + $0x74] ss:$24 sps:$4 sm:$0xff]   ;;  %v1408_v30 = vld [vmem:[#allocation9 + $0x70] ss:$24 sps:$4 sm:$0xff]  }
  0x5c   :  { %958 = vmatpush1.bf16.msra.mxu1 %v1326_v34  ;;  %988 = vmatprep.subr.bf16.mxu0 %v1331_v36  ;;  %v1413_v31 = vld [vmem:[#allocation9 + $0x44] ss:$24 sps:$4 sm:$0xff]   ;;  %v1411_v32 = vld [vmem:[#allocation9 + $0x40] ss:$24 sps:$4 sm:$0xff]   ;;  %v1416_v33 = vld [vmem:[#allocation9 + $0x14] ss:$24 sps:$4 sm:$0xff]  }
  0x5d   :  { %959 = vmatprep.subr.bf16.mxu1 %v1327_v35  ;;  %v1414_v34 = vld [vmem:[#allocation9 + $0x10] ss:$24 sps:$4 sm:$0xff]   ;;  %v1419_v35 = vld [vmem:[#allocation9 + $0x2e4] ss:$24 sps:$4 sm:$0xff]   ;;  %v1417_v36 = vld [vmem:[#allocation9 + $0x2e0] ss:$24 sps:$4 sm:$0xff]  }
  0x5f   :  { %989 = vmatpush1.bf16.msra.mxu0 %v1329_v37  ;;  %v1422_v37 = vld [vmem:[#allocation9 + $0x2b4] ss:$24 sps:$4 sm:$0xff]  }
  0x60   :  { %960 = vmatpush2.bf16.msra.mxu1 %v1332_v38  ;;  %990 = vmatprep.subr.bf16.mxu0 %v1337_v40  ;;  %v1420_v38 = vld [vmem:[#allocation9 + $0x2b0] ss:$24 sps:$4 sm:$0xff]   ;;  %v1423_v40 = vld [vmem:[#allocation9 + $0x280] ss:$24 sps:$4 sm:$0xff]  }
  0x61   :  { %961 = vmatprep.subr.bf16.mxu1 %v1333_v39  ;;  %v1425_v39 = vld [vmem:[#allocation9 + $0x284] ss:$24 sps:$4 sm:$0xff]  }
  0x63   :  { %991 = vmatpush1.bf16.msra.mxu0 %v1335_v41  ;;  %v1428_v41 = vld [vmem:[#allocation9 + $0x254] ss:$24 sps:$4 sm:$0xff]  }
  0x64   :  { %962 = vmatpush2.bf16.msra.mxu1 %v1338_v42  ;;  %992 = vmatprep.subr.bf16.mxu0 %v1343_v44  ;;  %v1426_v42 = vld [vmem:[#allocation9 + $0x250] ss:$24 sps:$4 sm:$0xff]   ;;  %v1429_v44 = vld [vmem:[#allocation9 + $0x220] ss:$24 sps:$4 sm:$0xff]  }
  0x65   :  { %963 = vmatprep.subr.bf16.mxu1 %v1339_v43  ;;  %v1431_v43 = vld [vmem:[#allocation9 + $0x224] ss:$24 sps:$4 sm:$0xff]  }
  0x67   :  { %993 = vmatpush1.bf16.msra.mxu0 %v1341_v45  ;;  %v1434_v45 = vld [vmem:[#allocation9 + $0x1f4] ss:$24 sps:$4 sm:$0xff]  }
  0x68   :  { %964 = vmatpush2.bf16.msra.mxu1 %v1344_v46  ;;  %994 = vmatprep.subr.bf16.mxu0 %v1349_v48  ;;  %v1432_v46 = vld [vmem:[#allocation9 + $0x1f0] ss:$24 sps:$4 sm:$0xff]   ;;  %v1435_v48 = vld [vmem:[#allocation9 + $0x1c0] ss:$24 sps:$4 sm:$0xff]  }
  0x69   :  { %965 = vmatprep.subr.bf16.mxu1 %v1345_v47  ;;  %v1437_v47 = vld [vmem:[#allocation9 + $0x1c4] ss:$24 sps:$4 sm:$0xff]  }
  0x6b   :  { %995 = vmatpush1.bf16.msra.mxu0 %v1347_v49  ;;  %v1440_v49 = vld [vmem:[#allocation9 + $0x194] ss:$24 sps:$4 sm:$0xff]  }
  0x6c   :  { %966 = vmatpush2.bf16.msra.mxu1 %v1350_v51  ;;  %996 = vmatprep.subr.bf16.mxu0 %v1355_v54  ;;  %v1438_v51 = vld [vmem:[#allocation9 + $0x190] ss:$24 sps:$4 sm:$0xff]  }
  0x6d   :  { %967 = vmatprep.subr.bf16.mxu1 %v1351_v52 }
  0x6f   :  { %997 = vmatpush1.bf16.msra.mxu0 %v1353_v55 }
  0x70   :  { %968 = vmatpush2.bf16.msra.mxu1 %v1356_v56  ;;  %998 = vmatprep.subr.bf16.mxu0 %v1361_v58 }
  0x71   :  { %969 = vmatprep.subr.bf16.mxu1 %v1357_v57 }
  0x73   :  { %999 = vmatpush1.bf16.msra.mxu0 %v1359_v59 }
  0x74   :  { %970 = vmatpush2.bf16.msra.mxu1 %v1362_v60  ;;  %1000 = vmatprep.subr.bf16.mxu0 %v1367_v62 }
  0x75   :  { %971 = vmatprep.subr.bf16.mxu1 %v1363_v61 }
  0x77   :  { %1001 = vmatpush2.bf16.msra.mxu0 %v1365_v63 }
  0x78   :  { %972 = vmatpush2.bf16.msra.mxu1 %v1368_v0  ;;  %1002 = vmatprep.subr.bf16.mxu0 %v1373_v2 }
  0x79   :  { %973 = vmatprep.subr.bf16.mxu1 %v1369_v1 }
  0x7b   :  { %1003 = vmatpush2.bf16.msra.mxu0 %v1371_v3 }
  0x7c   :  { %974 = vmatpush2.bf16.msra.mxu1 %v1374_v4  ;;  %1004 = vmatprep.subr.bf16.mxu0 %v1377_v6  ;;  %v116_v4 = vlaneseq }
  0x7d   :  { %1025 = vmatprep.subr.bf16.mxu1 %v1380_v7  ;;  %v431_v7 = vld [vmem:[#allocation11] sm:$0x3f] }
  0x7e   :  { %v117_v6 = vshrl.u32 %v116_v4, 7 }
  0x7f   :  { %976 = vmatmul.mubr.bf16.vlgmr.msra.gmra.mxu1 %v1687_v8  ;;  %1005 = vmatpush2.bf16.msra.mxu0 %v1375_v9  ;;  %v114_v9 = vld [vmem:[%s1713_s4] sm:$0x3f]  ;;  %s1619_s4 = smov [#allocation13]  }
  0x80   :  { %1026 = vmatpush1.bf16.msra.mxu1 %v1378_v10  ;;  %1006 = vmatprep.subr.bf16.mxu0 %v1383_v11  ;;  %v122_v10 = vsub.s32 1, %v117_v6  ;;  %s1137_s25 = sshll.u32 %s1619_s4, 4  ;;  %s1138_s25 = int_to_ptr.vmem [resolvable:$true] %s1137_s25 }
  0x81   :  { %1027 = vmatprep.subr.bf16.mxu1 %v1386_v12  ;;  %1057 = vmatprep.mubr.bf16.mxu1 %v334_v53  ;;  %s1561_s28 = scalar_lea.vmem %s1138_s25, 256  ;;  %p1566_p12 = scmp.lt.s32.totalorder %s1138_s25, %s1138_s25 }
  0x82   :  { %p1562_p11 = scmp.ne.s32.totalorder %s1138_s25, %s1561_s28  ;;  %p1567_p13 = scmp.lt.s32.totalorder %s1561_s28, %s1561_s28 }
  0x83   :  { %1007 = vmatpush2.bf16.msra.mxu0 %v1381_v13  ;;  %v440_v13 = vrot.slane %v431_v7, %v122_v10 }
  0x84   :  { %1028 = vmatpush1.bf16.msra.mxu1 %v1384_v14  ;;  %1008 = vmatprep.subr.bf16.mxu0 %v1389_v15  ;;  %v123_v14 = vrot.slane %v114_v9, %v122_v10  ;;  %p1568_p0 = por %p1567_p13, %p1566_p12 }
  0x85   :  { %1029 = vmatprep.subr.bf16.mxu1 %v1392_v16 }
  0x86   :  { %p1569_p1 = pnand %p1568_p0, %p1562_p11 }
  0x87   :  { %1009 = vmatpush2.bf16.msra.mxu0 %v1387_v17 }
  0x88   :  { %1030 = vmatpush1.bf16.msra.mxu1 %v1390_v18  ;;  %1010 = vmatprep.subr.bf16.mxu0 %v1395_v19 }
  0x89   :  { %1031 = vmatprep.subr.bf16.mxu1 %v1398_v20 }
  0x8b   :  { %1011 = vmatpush2.bf16.msra.mxu0 %v1393_v21 }
  0x8c   :  { %1032 = vmatpush1.bf16.msra.mxu1 %v1396_v22  ;;  %1012 = vmatprep.subr.bf16.mxu0 %v1401_v23 }
  0x8d   :  { %1033 = vmatprep.subr.bf16.mxu1 %v1404_v24  ;;  %v126_v24 = vsub.s32 2, %v117_v6 }
  0x8f   :  { %1013 = vmatpush2.bf16.msra.mxu0 %v1399_v25 }
  0x90   :  { %1034 = vmatpush1.bf16.msra.mxu1 %v1402_v26  ;;  %1014 = vmatprep.subr.bf16.mxu0 %v1407_v27  ;;  %v130_v27 = vsub.s32 3, %v117_v6 }
  0x91   :  { %1035 = vmatprep.subr.bf16.mxu1 %v1410_v28 }
  0x93   :  { %1015 = vmatpush2.bf16.msra.mxu0 %v1405_v29  ;;  %v444_v29 = vrot.slane %v431_v7, %v126_v24 }
  0x94   :  { %1036 = vmatpush1.bf16.msra.mxu1 %v1408_v30  ;;  %v127_v30 = vrot.slane %v114_v9, %v126_v24 }
  0x95   :  { %1037 = vmatprep.subr.bf16.mxu1 %v1413_v31  ;;  %v448_v31 = vrot.slane %v431_v7, %v130_v27 }
  0x96   :  { %1017 = vmatmul.mubr.bf16.vlgmr.msra.gmra.mxu0 %v1687_v8 }
  0x98   :  { %1038 = vmatpush1.bf16.msra.mxu1 %v1411_v32  ;;  %v131_v32 = vrot.slane %v114_v9, %v130_v27 }
  0x99   :  { %1039 = vmatprep.subr.bf16.mxu1 %v1416_v33 }
  0x9c   :  { %1040 = vmatpush1.bf16.msra.mxu1 %v1414_v34 }
  0x9d   :  { %1041 = vmatprep.subr.bf16.mxu1 %v1419_v35 }
  0xa0   :  { %1042 = vmatpush2.bf16.msra.mxu1 %v1417_v36 }
  0xa1   :  { %1043 = vmatprep.subr.bf16.mxu1 %v1422_v37 }
  0xa4   :  { %1044 = vmatpush2.bf16.msra.mxu1 %v1420_v38 }
  0xa5   :  { %1045 = vmatprep.subr.bf16.mxu1 %v1425_v39 }
  0xa8   :  { %1046 = vmatpush2.bf16.msra.mxu1 %v1423_v40 }
  0xa9   :  { %1047 = vmatprep.subr.bf16.mxu1 %v1428_v41 }
  0xac   :  { %1048 = vmatpush2.bf16.msra.mxu1 %v1426_v42 }
  0xad   :  { %1049 = vmatprep.subr.bf16.mxu1 %v1431_v43 }
  0xb0   :  { %1050 = vmatpush2.bf16.msra.mxu1 %v1429_v44 }
  0xb1   :  { %1051 = vmatprep.subr.bf16.mxu1 %v1434_v45  ;;  %v134_v45 = vsub.s32 4, %v117_v6 }
  0xb4   :  { %1052 = vmatpush2.bf16.msra.mxu1 %v1432_v46 }
  0xb5   :  { %1053 = vmatprep.subr.bf16.mxu1 %v1437_v47  ;;  %v138_v47 = vsub.s32 5, %v117_v6 }
  0xb8   :  { %1054 = vmatpush2.bf16.msra.mxu1 %v1435_v48  ;;  %v452_v48 = vrot.slane %v431_v7, %v134_v45 }
  0xb9   :  { %1055 = vmatprep.subr.bf16.mxu1 %v1440_v49 }
  0xbc   :  { %1056 = vmatpush2.bf16.msra.mxu1 %v1438_v51  ;;  %v135_v51 = vrot.slane %v114_v9, %v134_v45 }
  0xbf   :  { %1058 = vmatmul.mubr.bf16.vlgmr.msra.gmra.mxu1 %v1687_v8  ;;  %v118_v8 = vsub.s32 0, %v117_v6 }
  0xc1   :  { %v436_v11 = vrot.slane %v431_v7, %v118_v8  ;;  %v119_v12 = vrot.slane %v114_v9, %v118_v8 }
 0x106   :  { %v244_v52 = vpop.f32.mrf.mxu0 }
 0x107   :  { %v245_v16 = vadd.f32 %v244_v52, %v119_v12 }
 0x108   :  { %v246_v53 = vpop.f32.mrf.mxu0 }
 0x109   :  { %v247_v19 = vadd.f32 %v246_v53, %v123_v14  ;;  %v456_v53 = vrot.slane %v431_v7, %v138_v47 }
 0x10a   :  { %v248_v54 = vpop.f32.mrf.mxu0 }
 0x10c   :  { %v249_v55 = vpop.f32.mrf.mxu0 }
 0x10d   :  { %v139_v55 = vrot.slane %v114_v9, %v138_v47 }
 0x10e   :  { %v285_v56 = vpop.f32.mrf.mxu0 }
 0x10f   :  { %v286_v34 = vadd.f32 %v285_v56, %v127_v30 }
 0x110   :  { %v287_v57 = vpop.f32.mrf.mxu0 }
 0x111   :  { %v288_v36 = vadd.f32 %v287_v57, %v131_v32 }
 0x112   :  { %v289_v58 = vpop.f32.mrf.mxu0 }
 0x114   :  { %v290_v59 = vpop.f32.mrf.mxu0 }
 0x116   :  { %v1692_v60 = vpop.f32.mrf.mxu0 }
 0x118   :  { %v1694_v61 = vpop.f32.mrf.mxu0 }
 0x11a   :  { %v330_v62 = vpop.f32.mrf.mxu0 }
 0x11b   :  { %v327_v62 = vadd.f32 %v1692_v60, %v135_v51 }
 0x11c   :  { %v331_v63 = vpop.f32.mrf.mxu0 }
 0x13f   :  { %v977_v0 = vpop.f32.mrf.mxu1 }
 0x140   :  { %v978_v15 = vadd.f32 %v977_v0, %v436_v11 }
 0x141   :  { %v979_v1 = vpop.f32.mrf.mxu1 }
 0x142   :  { %v980_v17 = vadd.f32 %v979_v1, %v440_v13  ;;  %v1066_v20 = vadd.f32 %v978_v15, %v245_v16 }
 0x143   :  { %v981_v2 = vpop.f32.mrf.mxu1 }
 0x144   :  { %v1067_v22 = vadd.f32 %v980_v17, %v247_v19  ;;  %v1263_v25 = vmul.f32 -1.442695, %v1066_v20 }
 0x145   :  { %v982_v3 = vpop.f32.mrf.mxu1 }
 0x146   :  { %v1264_v28 = vmul.f32 -1.442695, %v1067_v22  ;;  %1441 = vpow2.f32 %v1263_v25  ;;  %v329_v3 = vadd.f32 %v1694_v61, %v139_v55 }
 0x148   :  { %1443 = vpow2.f32 %v1264_v28 }
 0x153   :  { %v1442_v41 = vpop.eup %1441 }
 0x154   :  { %v1074_v43 = vadd.f32 1.0, %v1442_v41 }
 0x155   :  { %v1444_v42 = vpop.eup %1443 }
 0x156   :  { %v1018_v18 = vpop.f32.mrf.mxu0  ;;  %v1075_v44 = vadd.f32 1.0, %v1444_v42 }
 0x157   :  { %v1019_v33 = vadd.f32 %v1018_v18, %v444_v29 }
 0x158   :  { %v1020_v21 = vpop.f32.mrf.mxu0 }
 0x159   :  { %v1021_v35 = vadd.f32 %v1020_v21, %v448_v31  ;;  %v1080_v37 = vadd.f32 %v1019_v33, %v286_v34 }
 0x15a   :  { %v1022_v23 = vpop.f32.mrf.mxu0 }
 0x15b   :  { %v1081_v38 = vadd.f32 %v1021_v35, %v288_v36  ;;  %v1265_v39 = vmul.f32 -1.442695, %v1080_v37 }
 0x15c   :  { %v1023_v26 = vpop.f32.mrf.mxu0 }
 0x15d   :  { %v1266_v40 = vmul.f32 -1.442695, %v1081_v38  ;;  %1445 = vpow2.f32 %v1265_v39 }
 0x15f   :  { %1447 = vpow2.f32 %v1266_v40 }
 0x160   :  { %1449 = vrcp.f32 %v1074_v43 }
 0x161   :  { %1451 = vrcp.f32 %v1075_v44 }
 0x16a   :  { %v1446_v46 = vpop.eup %1445 }
 0x16b   :  { %v1088_v52 = vadd.f32 1.0, %v1446_v46 }
 0x16c   :  { %v1448_v49 = vpop.eup %1447 }
 0x16d   :  { %v1089_v56 = vadd.f32 1.0, %v1448_v49  ;;  %v1450_v58 = vpop.eup %1449  ;;  %1453 = vrcp.f32 %v1088_v52 }
 0x16e   :  { %v1452_v1 = vpop.eup %1451 }
 0x16f   :  { %1455 = vrcp.f32 %v1089_v56 }
 0x17a   :  { %v1454_v9 = vpop.eup %1453 }
 0x17b   :  { %v1100_v11 = vsub.f32 1.0, %v1454_v9  ;;  %v1104_v14 = vmul.f32 %v1454_v9, %v1683_v5 }
 0x17c   :  { %v1456_v10 = vpop.eup %1455 }
 0x17d   :  { %v1101_v13 = vsub.f32 1.0, %v1456_v10  ;;  %v1105_v61 = vmul.f32 %v1456_v10, %v1679_v50 }
 0x17f   :  { %v1059_v54 = vpop.f32.mrf.mxu1 }
 0x180   :  { %v1060_v57 = vadd.f32 %v1059_v54, %v452_v48 }
 0x181   :  { %v1061_v59 = vpop.f32.mrf.mxu1 }
 0x182   :  { %v1094_v63 = vmul.f32 %v1450_v58, %v1060_v57  ;;  %v1062_v0 = vadd.f32 %v1061_v59, %v456_v53 }
 0x183   :  { %v1063_v2 = vpop.f32.mrf.mxu1 }
 0x184   :  { %v1096_v4 = vadd.f32 %v1094_v63, %v327_v62  ;;  %v1095_v6 = vmul.f32 %v1452_v1, %v1062_v0 }
 0x185   :  { %v1064_v8 = vpop.f32.mrf.mxu1 }
 0x186   :  { %1457 = vtanh.f32 %v1096_v4  ;;  %v1097_v7 = vadd.f32 %v1095_v6, %v329_v3 }
 0x188   :  { %1459 = vtanh.f32 %v1097_v7 }
 0x193   :  { %v1458_v12 = vpop.eup %1457 }
 0x194   :  { %v1102_v60 = vmul.f32 %v1458_v12, %v1100_v11 }
 0x195   :  { %v1460_v15 = vpop.eup %1459 }
 0x196   :  { %v1103_v16 = vmul.f32 %v1460_v15, %v1101_v13  ;;  %v1106_v17 = vadd.f32 %v1104_v14, %v1102_v60 }
 0x198   :  { %v1107_v18 = vadd.f32 %v1105_v61, %v1103_v16  ;;  %1119 = vst [vmem:[#allocation13] sm:$0xff] %v1106_v17 }
 0x19a   :  { %v1268_v19 = vpack.c.bf16 %v1107_v18, %v1106_v17  ;;  %1120 = vst [vmem:[#allocation13 + $0x8] sm:$0xff] %v1107_v18 }
 0x19b   :  { %1572 = shalt.err (!%p1569_p1)
}
 0x19c   :  { %1140 = dma.vmem_to_hbm [thread:$0]  %s1138_s25, 256, %s1716_s7, [#allocation14]   ;;  %1118 = vst [vmem:[#allocation12] sm:$0xff] %v1268_v19 }
 0x19d   :  { %s1581_s8 = scalar_lea.vmem %s1128_s27, 128  ;;  %p1586_p3 = scmp.lt.s32.totalorder %s1128_s27, %s1128_s27 }
 0x19e   :  { %p1582_p2 = scmp.ne.s32.totalorder %s1128_s27, %s1581_s8  ;;  %p1587_p4 = scmp.lt.s32.totalorder %s1581_s8, %s1581_s8 }
 0x1a0   :  { %p1588_p5 = por %p1587_p4, %p1586_p3 }
 0x1a2   :  { %p1589_p6 = pnand %p1588_p5, %p1582_p2 }
 0x1a4   :  { %1592 = shalt.err (!%p1589_p6)
}
 0x1a5   :  { %1130 = dma.vmem_to_hbm [thread:$0]  %s1128_s27, 128, %s1715_s6, [#allocation5]  }
 0x1a6   :  { %1607 = dma.done.wait [#allocation5], 128  }
 0x1a7   :  { %1608 = vsyncadd [#allocation5], 4294967168 }
 0x1a8   :  { %1609 = dma.done.wait [#allocation14], 256  }
 0x1a9   :  { %1610 = vsyncadd [#allocation14], 4294967040 }
 0x1aa   :  { %1147 = vsyncpa [#allocation4], 1 }
 0x1ab   :  { %1148 = vsyncpa [#allocation7], 1 }
 0x1ac   :  { %1149 = vsyncpa [#allocation10], 1 }
 0x1ad   :  { %1150 = vsyncpa [#allocation5], 1 }
 0x1ae   :  { %1151 = vsyncpa [#allocation14], 1 }

</bundles_post_ra>
